<compile_context>
chip_gen: v7x
topology: tpu7x:2x2x1
jax: 0.10.0
libtpu: 0.0.40
codegen_flags: <defaults>
</compile_context>

<pallas_src>
import jax
import jax.numpy as jnp
from jax.experimental import pallas as pl
from jax.experimental.pallas import tpu as pltpu


def _deconv_matmul_kernel(x_ref, w_ref, b_ref, o_ref):
    # Hot path: (TM, Cin) @ (Cin, Kp) on the MXU, f32 accumulate, bias add on the VPU.
    acc = jnp.dot(x_ref[...], w_ref[...], preferred_element_type=jnp.float32)
    o_ref[...] = (acc + b_ref[...]).astype(o_ref.dtype)


def deconv_bn_forward(x_nchw, weight, bias, *, tm_target=1024):
    """ConvTranspose2d(kernel_size=2, stride=2, padding=0) forward.

    x_nchw : (N, Cin, H, W)
    weight : (Cin, Cout, 2, 2)   (PyTorch ConvTranspose2d weight layout)
    bias   : (Cout,)
    returns: (N, Cout, 2H, 2W)
    """
    N, Cin, H, W_sp = x_nchw.shape
    Cout = weight.shape[1]
    M = N * H * W_sp

    kcols = 4 * Cout                       # true output columns (kh*kw*Cout)
    kp = pl.cdiv(kcols, 128) * 128         # lane-dense padded width (multiple of 128)

    itemsize = jnp.dtype(x_nchw.dtype).itemsize

    # --- choose the M tile: multiple of 8, capped so double-buffered in/out tiles
    # --- comfortably fit v7x's scoped VMEM (64 MiB physical, 32 MiB default scope).
    tm = max(8, (tm_target // 8) * 8)
    vmem_budget = 24 * 1024 * 1024
    while tm > 8 and 2 * tm * (Cin + kp) * itemsize > vmem_budget:
        tm //= 2
    tm = max(8, min(tm, pl.cdiv(M, 8) * 8))
    tm = (tm // 8) * 8

    num_tiles = pl.cdiv(M, tm)
    m_pad = num_tiles * tm

    # --- layout glue (kept minimal; X transpose is required by the NCHW input contract).
    # TODO(synk): keep activations NHWC end-to-end in the surrounding model so this
    # transpose and the output deinterleave below fuse away entirely.
    x_flat = jnp.transpose(x_nchw, (0, 2, 3, 1)).reshape(M, Cin)       # (M, Cin)
    if m_pad != M:
        x_flat = jnp.pad(x_flat, ((0, m_pad - M), (0, 0)))

    w_mat = jnp.transpose(weight, (0, 2, 3, 1)).reshape(Cin, kcols)    # (Cin, kh*kw*Cout)
    b_mat = jnp.tile(bias, 4).reshape(1, kcols).astype(jnp.float32)    # (1, kh*kw*Cout)
    if kp != kcols:
        w_mat = jnp.pad(w_mat, ((0, 0), (0, kp - kcols)))
        b_mat = jnp.pad(b_mat, ((0, 0), (0, kp - kcols)))

    # Explicit scoped-VMEM budget: double-buffered X/Y tiles + resident W/B + headroom.
    vmem_limit = 2 * tm * (Cin + kp) * itemsize + Cin * kp * itemsize + kp * 4
    vmem_limit = int(min(max(vmem_limit * 2 + (4 << 20), 16 << 20), 56 << 20))

    y_flat = pl.pallas_call(
        _deconv_matmul_kernel,
        out_shape=jax.ShapeDtypeStruct((m_pad, kp), x_nchw.dtype),
        grid=(num_tiles,),
        in_specs=[
            pl.BlockSpec((tm, Cin), lambda i: (i, 0)),   # streamed X tiles
            pl.BlockSpec((Cin, kp), lambda i: (0, 0)),   # W resident in VMEM
            pl.BlockSpec((1, kp), lambda i: (0, 0)),     # bias resident in VMEM
        ],
        out_specs=pl.BlockSpec((tm, kp), lambda i: (i, 0)),
        compiler_params=pltpu.CompilerParams(
            dimension_semantics=("parallel",),           # shard M tiles across TCs (v7x)
            vmem_limit_bytes=vmem_limit),
    )(x_flat, w_mat, b_mat)

    # Drop row / column padding, then interleave kernel taps into the upsampled grid.
    y_flat = y_flat[:M, :kcols]
    y = y_flat.reshape(N, H, W_sp, 2, 2, Cout)           # (N, H, W, kh, kw, Cout)
    y = jnp.transpose(y, (0, 5, 1, 3, 2, 4))             # (N, Cout, H, kh, W, kw)
    y = y.reshape(N, Cout, 2 * H, 2 * W_sp)
    return y


def _reference(x_nchw, weight, bias):
    # Independent pure-JAX reference of ConvTranspose2d(k=2, s=2, p=0).
    N, Cin, H, W_sp = x_nchw.shape
    Cout = weight.shape[1]
    t = jnp.einsum('nchw,cokl->nohkwl', x_nchw, weight)  # (N, Cout, H, kh, W, kw)
    y = t.reshape(N, Cout, 2 * H, 2 * W_sp)
    return y + bias[None, :, None, None]


if __name__ == "__main__":
    key = jax.random.PRNGKey(0)
    k_x, k_w, k_b = jax.random.split(key, 3)

    N, Cin, Cout, H, W = 2, 4, 8, 16, 16

    x = jax.random.normal(k_x, (N, Cin, H, W), dtype=jnp.float32)
    # Deterministic synthetic init (roughly PyTorch-scale uniform).
    fan_in = Cin * 2 * 2
    bound = 1.0 / (fan_in ** 0.5)
    weight = jax.random.uniform(k_w, (Cin, Cout, 2, 2), dtype=jnp.float32,
                                minval=-bound, maxval=bound)
    bias = jax.random.uniform(k_b, (Cout,), dtype=jnp.float32,
                              minval=-bound, maxval=bound)

    # tm_target=128 exercises the multi-tile pipelined path at this small size;
    # production default is tm_target=1024.
    out = deconv_bn_forward(x, weight, bias, tm_target=128)
    out = jax.block_until_ready(out)

    ref = _reference(x, weight, bias)
    assert out.shape == (N, Cout, 2 * H, 2 * W), out.shape
    assert jnp.allclose(out, ref, atol=1e-5, rtol=1e-5), "mismatch vs reference"

    print("KERNEL_OK")
</pallas_src>

<mosaic_0001>
module attributes {stable_mosaic.version = 11 : i64} {
  func.func @_deconv_matmul_kernel(%arg0: i32, %arg1: memref<128x4xf32, #tpu.memory_space<vmem>>, %arg2: memref<4x128xf32, #tpu.memory_space<vmem>>, %arg3: memref<1x128xf32, #tpu.memory_space<vmem>>, %arg4: memref<128x128xf32, #tpu.memory_space<vmem>>) attributes {dimension_semantics = [#tpu.dimension_semantics<parallel>], iteration_bounds = array<i64: 4>, scalar_prefetch = 0 : i64, scratch_operands = 0 : i64, tpu.core_type = #tpu.core_type<tc>, window_params = [{transform_indices = @transform_0, window_bounds = array<i64: 128, 4>}, {pipeline_mode = #tpu.pipeline_mode<synchronous>, transform_indices = @transform_1, window_bounds = array<i64: 4, 128>}, {pipeline_mode = #tpu.pipeline_mode<synchronous>, transform_indices = @transform_2, window_bounds = array<i64: 1, 128>}, {transform_indices = @transform_3, window_bounds = array<i64: 128, 128>}]} {
    %c0 = arith.constant 0 : index
    %c0_0 = arith.constant 0 : index
    %0 = vector.load %arg1[%c0, %c0_0] : memref<128x4xf32, #tpu.memory_space<vmem>>, vector<128x4xf32>
    %c0_1 = arith.constant 0 : index
    %c0_2 = arith.constant 0 : index
    %1 = vector.load %arg2[%c0_1, %c0_2] : memref<4x128xf32, #tpu.memory_space<vmem>>, vector<4x128xf32>
    %cst = arith.constant dense<0.000000e+00> : vector<128x128xf32>
    %2 = tpu.matmul %0, %1, %cst {dimension_numbers = #tpu.dot_dimension_numbers<[1], [0], [0], [1], [0, 0, 1, 1], [], []>} : vector<128x4xf32>, vector<4x128xf32>, vector<128x128xf32> -> vector<128x128xf32>
    %c0_3 = arith.constant 0 : index
    %c0_4 = arith.constant 0 : index
    %3 = vector.load %arg3[%c0_3, %c0_4] : memref<1x128xf32, #tpu.memory_space<vmem>>, vector<1x128xf32>
    %4 = vector.broadcast %3 : vector<1x128xf32> to vector<128x128xf32>
    %5 = arith.addf %2, %4 : vector<128x128xf32>
    %c0_5 = arith.constant 0 : index
    %c0_6 = arith.constant 0 : index
    %6 = vector.load %arg4[%c0_5, %c0_6] : memref<128x128xf32, #tpu.memory_space<vmem>>, vector<128x128xf32>
    tpu.vector_store %arg4[%c0_5, %c0_6], %5 {strides = array<i32>} : memref<128x128xf32, #tpu.memory_space<vmem>>, vector<128x128xf32>,
    return
  }
  func.func @transform_0(%arg0: i32) -> (i32, i32) {
    %c0_i32 = arith.constant 0 : i32
    %c0_i32_0 = arith.constant 0 : i32
    return %arg0, %c0_i32 : i32, i32
  }
  func.func @transform_1(%arg0: i32) -> (i32, i32) {
    %c0_i32 = arith.constant 0 : i32
    %c0_i32_0 = arith.constant 0 : i32
    %c0_i32_1 = arith.constant 0 : i32
    return %c0_i32, %c0_i32_0 : i32, i32
  }
  func.func @transform_2(%arg0: i32) -> (i32, i32) {
    %c0_i32 = arith.constant 0 : i32
    %c0_i32_0 = arith.constant 0 : i32
    %c0_i32_1 = arith.constant 0 : i32
    return %c0_i32, %c0_i32_0 : i32, i32
  }
  func.func @transform_3(%arg0: i32) -> (i32, i32) {
    %c0_i32 = arith.constant 0 : i32
    %c0_i32_0 = arith.constant 0 : i32
    return %arg0, %c0_i32 : i32, i32
  }
}

</mosaic_0001>

<bundles_post_ra>
// kernel: tpu_custom_call.1
= control target key start
LH: loop header
LB: loop body
LE: loop exit
PB: predicated region body
PF: predicated region fallthrough
CT: control target
= control target key end

     0   :  { %8 = vsyncpa [#allocation3], 0  ;;  %s837_s0 = inlined_call_operand.vmem [shape: f32[512,4], index: 0, kind: input, shape index: {}]   ;;  %s838_s1 = inlined_call_operand.vmem [shape: f32[4,128], index: 1, kind: input, shape index: {}]   ;;  %s839_s2 = inlined_call_operand.vmem [shape: f32[1,128], index: 2, kind: input, shape index: {}]   ;;  %s840_s3 = inlined_call_operand.hbm [shape: f32[512,128], index: 3, kind: output, shape index: {}]  }
   0x1   :  { %10 = vsyncpa [#allocation3 + $0x1], 0  ;;  %s690_s12 = smov 0   ;;  %s692_s13 = smov 0  }
   0x2   :  { %s694_s14 = smov 0   ;;  %s696_s15 = smov 0  }
   0x3 LB: > { %s711_s16 = sadd.s32 4294967295, %s665_s15   ;;  %s486_s17 = sadd.s32 4294967294, %s665_s15   ;;  %s665_s15 = sphi %s696_s15, %s846_s15   ;;  %s661_s14 = sphi %s694_s14, %s845_s14   ;;  %s657_s13 = sphi %s692_s13, %s844_s13   ;;  %s653_s12 = sphi %s690_s12, %s843_s12  }
   0x4   : > { %s715_s18 = sadd.s32 1, %s665_s15   ;;  %s91_s19 = sadd.s32 1, %s661_s14 }
   0x5   : > { %s88_s20 = ssub.s32 %s665_s15, %s715_s18  ;;  %p101_p0 = scmp.ne.s32.totalorder %s661_s14, %s657_s13 }
   0x6   : > { %p89_p1 = scmp.eq.s32.totalorder %s88_s20, 0  ;;  %p102_p2 = scmp.eq.s32.totalorder %s711_s16, 3 }
   0x7   : > { %p107_p3 = scmp.ne.s32.totalorder %s657_s13, %s653_s12  ;;  %p108_p4 = scmp.eq.s32.totalorder %s486_s17, 3 }
   0x8   : > { %s726_s21 = scalar_select %p89_p1, %s661_s14, %s91_s19  }
   0x9   : > { %p728_p5 = por %p102_p2, %p101_p0  ;;  %p732_p6 = por %p108_p4, %p107_p3 }
   0xa   : > { %p489_p7 = scmp.ge.s32.totalorder %s665_s15, 1  ;;  %p141_p8 = scmp.lt.s32.totalorder %s665_s15, 5 }
   0xc   : > { %p142_p9 = pnand %p489_p7, %p141_p8 }
   0xd   : > { %v188_v0 = vld [vmem:[%s838_s1] sm:$0xf] (!%p142_p9)  ;;  %vm245_vm0 = vcmask (!%p142_p9), 1043456   ;;  %s491_s26 = sshll.u32 (!%p142_p9), %s711_s16, 4  ;;  %vm196_vm1 = vcmask (!%p142_p9), 31744   ;;  %s162_s4 = sand.u32 (!%p142_p9), 1, %s657_s13  }
   0xe   : > { %145 = sbr.rel (%p142_p9) target bundleno = 269 (0x10d), region = 32  ;;  %534 = vmatprep.subr.msk.mxu0 (!%p142_p9), %vm245_vm0, %v188_v0  ;;  %560 = vmatprep.subr.msk.mxu1 (!%p142_p9), %vm245_vm0, %v188_v0  ;;  %p166_p10 = scmp.lt.s32.totalorder (!%p142_p9), %s491_s26, 63  ;;  %v493_v17 = vld [vmem:[%s839_s2] ss:$0 sm:$0xff] (!%p142_p9) }
   0xf   : > { %535 = vmatpush3.msk.msra.mxu0 (!%p142_p9), %vm245_vm0, %v188_v0  ;;  %561 = vmatpush3.msk.msra.mxu1 (!%p142_p9), %vm245_vm0, %v188_v0  ;;  %s490_s5 = sshll.u32 (!%p142_p9), %s162_s4, 7  ;;  %s516_s9 = sshll.u32 (!%p142_p9), %s711_s16, 11 }
  0x10   : > { %s767_s8 = scalar_lea.vmem (!%p142_p9), [#allocation2], %s490_s5  ;;  %s786_s16 = scalar_lea.hbm (!%p142_p9), %s840_s3, %s516_s9 }
  0x11   : > { %s424_s10 = sshll.u32 (!%p142_p9), %s767_s8, 4  ;;  %s796_s19 = scalar_lea.sflag (!%p142_p9), [#allocation3], %s162_s4  ;;  %s788_s10 = int_to_ptr.vmem [resolvable:$true] %s424_s10 }
  0x12   : > { %s603_s20 = scalar_lea.vmem (!%p142_p9), %s788_s10, 2048  ;;  %s667_s24 = smov (!%p142_p9), [#allocation2]  }
  0x13   : > { %p604_p11 = scmp.ne.s32.totalorder (!%p142_p9), %s788_s10, %s603_s20  ;;  %s607_s25 = sshll.u32 (!%p142_p9), %s667_s24, 4  ;;  %s608_s25 = int_to_ptr.vmem [resolvable:$false] %s607_s25 }
  0x14   : > { %p610_p0 = scmp.lt.s32.totalorder (!%p142_p9), %s788_s10, %s608_s25 }
  0x15   : > { %s848_s26 = smov (!%p166_p10, %s491_s26), 63  ;;  %p605_p12 = pnand %p604_p11, %p728_p5 }
  0x16   : > { %s492_s27 = sshll.u32 %s848_s26, 3  ;;  %s609_s26 = scalar_lea.vmem %s608_s25, 4096 }
  0x17   : > { %s169_s30 = scalar_lea.vmem %s837_s0, %s492_s27  ;;  %p606_p13 = pneg %p605_p12 }
  0x18   : > { %v172_v1 = vld [vmem:[%s169_s30] sm:$0xff]  ;;  %v173_v3 = vld [vmem:[%s169_s30 + $0x8] sm:$0xff]  ;;  %v174_v5 = vld [vmem:[%s169_s30 + $0x10] sm:$0xff]  ;;  %p611_p1 = scmp.lt.s32.totalorder %s609_s26, %s603_s20 }
  0x19   : > { %v180_v2 = vld [vmem:[%s169_s30 + $0x40] sm:$0xff]  ;;  %536 = vmatprep.mubr.msk.f32.mxu0 %vm196_vm1, %v172_v1  ;;  %v181_v4 = vld [vmem:[%s169_s30 + $0x48] sm:$0xff]  ;;  %v182_v6 = vld [vmem:[%s169_s30 + $0x50] sm:$0xff] }
  0x1a   : > { %548 = vmatprep.mubr.msk.f32.mxu1 %vm196_vm1, %v180_v2  ;;  %537 = vmatmul.mubr.msk.f32.vlgmr.msra.gmra.mrb[0].mxu0 %vm196_vm1, %v173_v3  ;;  %v175_v7 = vld [vmem:[%s169_s30 + $0x18] sm:$0xff]  ;;  %v176_v9 = vld [vmem:[%s169_s30 + $0x20] sm:$0xff]  ;;  %v177_v11 = vld [vmem:[%s169_s30 + $0x28] sm:$0xff]  ;;  %p612_p2 = por %p611_p1, %p610_p0 }
  0x1b   : > { %549 = vmatmul.mubr.msk.f32.vlgmr.msra.gmra.mrb[0].mxu1 %vm196_vm1, %v181_v4  ;;  %539 = vmatprep.mubr.msk.f32.mxu0 %vm196_vm1, %v174_v5  ;;  %v183_v8 = vld [vmem:[%s169_s30 + $0x58] sm:$0xff]  ;;  %v184_v10 = vld [vmem:[%s169_s30 + $0x60] sm:$0xff]  ;;  %v185_v12 = vld [vmem:[%s169_s30 + $0x68] sm:$0xff] }
  0x1c   : > { %551 = vmatprep.mubr.msk.f32.mxu1 %vm196_vm1, %v182_v6  ;;  %v178_v13 = vld [vmem:[%s169_s30 + $0x30] sm:$0xff]  ;;  %v179_v15 = vld [vmem:[%s169_s30 + $0x38] sm:$0xff]  ;;  %p613_p3 = pnand %p612_p2, %p606_p13 }
  0x1d   : > { %v186_v14 = vld [vmem:[%s169_s30 + $0x70] sm:$0xff]  ;;  %v187_v16 = vld [vmem:[%s169_s30 + $0x78] sm:$0xff] }
  0x1e   : > { %540 = vmatmul.mubr.msk.f32.gmra.mrb[2].mxu0 %vm196_vm1, %v175_v7 }
  0x1f   : > { %552 = vmatmul.mubr.msk.f32.gmra.mrb[2].mxu1 %vm196_vm1, %v183_v8  ;;  %542 = vmatprep.mubr.msk.f32.mxu0 %vm196_vm1, %v176_v9 }
  0x20   : > { %554 = vmatprep.mubr.msk.f32.mxu1 %vm196_vm1, %v184_v10 }
  0x22   : > { %543 = vmatmul.mubr.msk.f32.gmra.mrb[4].mxu0 %vm196_vm1, %v177_v11 }
  0x23   : > { %555 = vmatmul.mubr.msk.f32.gmra.mrb[4].mxu1 %vm196_vm1, %v185_v12  ;;  %545 = vmatprep.mubr.msk.f32.mxu0 %vm196_vm1, %v178_v13 }
  0x24   : > { %557 = vmatprep.mubr.msk.f32.mxu1 %vm196_vm1, %v186_v14 }
  0x26   : > { %546 = vmatmul.mubr.msk.f32.gmra.mrb[6].mxu0 %vm196_vm1, %v179_v15 }
  0x27   : > { %558 = vmatmul.mubr.msk.f32.gmra.mrb[6].mxu1 %vm196_vm1, %v187_v16 }
  0xed   : > { %v538_v18 = vpop.f32.mrb[0].mxu0 }
  0xee   : > { %v550_v19 = vpop.f32.mrb[0].mxu1  ;;  %v321_v20 = vadd.f32 %v538_v18, %v493_v17  ;;  %v315_v22 = vpop.f32.mrb[1].mxu0 }
  0xef   : > { %v361_v21 = vadd.f32 %v550_v19, %v493_v17  ;;  %v355_v23 = vpop.f32.mrb[1].mxu1  ;;  %v316_v24 = vadd.f32 %v493_v17, %v315_v22 }
  0xf0   : > { %v356_v25 = vadd.f32 %v493_v17, %v355_v23  ;;  %395 = vst [vmem:[%s767_s8 + $0x8] sm:$0xff] %v321_v20 }
  0xf1   : > { %403 = vst [vmem:[%s767_s8 + $0x48] sm:$0xff] %v361_v21  ;;  %394 = vst [vmem:[%s767_s8] sm:$0xff] %v316_v24  ;;  %v541_v26 = vpop.f32.mrb[2].mxu0 }
  0xf2   : > { %402 = vst [vmem:[%s767_s8 + $0x40] sm:$0xff] %v356_v25  ;;  %v553_v27 = vpop.f32.mrb[2].mxu1  ;;  %v331_v28 = vadd.f32 %v541_v26, %v493_v17  ;;  %v325_v30 = vpop.f32.mrb[3].mxu0 }
  0xf3   : > { %v371_v29 = vadd.f32 %v553_v27, %v493_v17  ;;  %v365_v31 = vpop.f32.mrb[3].mxu1  ;;  %v326_v32 = vadd.f32 %v493_v17, %v325_v30 }
  0xf4   : > { %v366_v33 = vadd.f32 %v493_v17, %v365_v31  ;;  %397 = vst [vmem:[%s767_s8 + $0x18] sm:$0xff] %v331_v28 }
  0xf5   : > { %405 = vst [vmem:[%s767_s8 + $0x58] sm:$0xff] %v371_v29  ;;  %396 = vst [vmem:[%s767_s8 + $0x10] sm:$0xff] %v326_v32  ;;  %v544_v34 = vpop.f32.mrb[4].mxu0 }
  0xf6   : > { %404 = vst [vmem:[%s767_s8 + $0x50] sm:$0xff] %v366_v33  ;;  %v556_v35 = vpop.f32.mrb[4].mxu1  ;;  %v341_v36 = vadd.f32 %v544_v34, %v493_v17  ;;  %v335_v38 = vpop.f32.mrb[5].mxu0 }
  0xf7   : > { %v381_v37 = vadd.f32 %v556_v35, %v493_v17  ;;  %v375_v39 = vpop.f32.mrb[5].mxu1  ;;  %v336_v40 = vadd.f32 %v493_v17, %v335_v38 }
  0xf8   : > { %v376_v41 = vadd.f32 %v493_v17, %v375_v39  ;;  %399 = vst [vmem:[%s767_s8 + $0x28] sm:$0xff] %v341_v36 }
  0xf9   : > { %407 = vst [vmem:[%s767_s8 + $0x68] sm:$0xff] %v381_v37  ;;  %398 = vst [vmem:[%s767_s8 + $0x20] sm:$0xff] %v336_v40  ;;  %v547_v42 = vpop.f32.mrb[6].mxu0 }
  0xfa   : > { %406 = vst [vmem:[%s767_s8 + $0x60] sm:$0xff] %v376_v41  ;;  %v559_v43 = vpop.f32.mrb[6].mxu1  ;;  %v351_v44 = vadd.f32 %v547_v42, %v493_v17  ;;  %v345_v46 = vpop.f32.mrb[7].mxu0 }
  0xfb   : > { %v391_v45 = vadd.f32 %v559_v43, %v493_v17  ;;  %v385_v47 = vpop.f32.mrb[7].mxu1  ;;  %v346_v48 = vadd.f32 %v493_v17, %v345_v46 }
  0xfc   : > { %v386_v49 = vadd.f32 %v493_v17, %v385_v47  ;;  %401 = vst [vmem:[%s767_s8 + $0x38] sm:$0xff] %v351_v44 }
  0xfd   : > { %409 = vst [vmem:[%s767_s8 + $0x78] sm:$0xff] %v391_v45  ;;  %400 = vst [vmem:[%s767_s8 + $0x30] sm:$0xff] %v346_v48 }
  0xfe   : > { %408 = vst [vmem:[%s767_s8 + $0x70] sm:$0xff] %v386_v49 }
  0xff   : > { %616 = shalt.err (!%p613_p3)
}
 0x100   : > { %s617_s27 = scalar_lea.hbm %s786_s16, 2048  ;;  %s621_s30 = scalar_lea.hbm %s840_s3, 8192 }
 0x101   : > { %p618_p4 = scmp.ne.s32.totalorder %s786_s16, %s617_s27  ;;  %p622_p9 = scmp.lt.u32.totalorder %s786_s16, %s840_s3 }
 0x102   : > { %p623_p10 = scmp.lt.u32.totalorder %s621_s30, %s617_s27  ;;  %p625_p12 = scmp.lt.u32.totalorder %s617_s27, %s786_s16 }
 0x103   : > { %p619_p7 = pnand %p618_p4, %p728_p5 }
 0x104   : > { %p624_p11 = por %p623_p10, %p622_p9 }
 0x105   : > { %p620_p8 = pneg %p619_p7 }
 0x106   : > { %p626_p13 = por %p625_p12, %p624_p11 }
 0x108   : > { %p627_p0 = pnand %p626_p13, %p620_p8 }
 0x10a   : > { %630 = shalt.err (!%p627_p0)
}
 0x10b   : > { %s668_s6 = smov 128   ;;  %s669_s7 = smov 8  }
 0x10c   : > { %562 = dma.vmem_to_hbm [thread:$0]  (%p728_p5), %s788_s10, 2048, %s786_s16, %s796_s19, %s668_s6, %s668_s6, %s669_s7  }
 0x10d PF: > { %p568_p1 = scmp.ge.s32.totalorder %s665_s15, 2  ;;  %s439_s8 = sand.u32 1, %s653_s12  }
 0x10e   : > { %s440_s9 = scalar_lea.sflag [#allocation3], %s439_s8 }
 0x10f   : > { %p565_p2 = pnand %p568_p1, %p732_p6 }
 0x111   : > { %648 = dma.done.wait (!%p565_p2), %s440_s9, 2048  }
 0x112   : > { %650 = vsyncadd (!%p565_p2), %s440_s9, 4294965248  ;;  %p13_p3 = scmp.ge.s32.totalorder %s715_s18, 6   ;;  %s843_s12 = smov %s657_s13 }
 0x113   : > { %s844_s13 = smov %s661_s14  ;;  %s845_s14 = smov %s726_s21 }
 0x114   : > { %s846_s15 = smov %s715_s18  ;;  %15 = sbr.rel (!%p13_p3) target bundleno = 3 (0x3), region = 67 }
 0x11b   :  { %445 = vsyncpa [#allocation3], 1 }
 0x11c   :  { %447 = vsyncpa [#allocation3 + $0x1], 1 }

</bundles_post_ra>
